<compile_context>
chip_gen: v5e
topology: v5e:2x2
jax: 0.10.0
libtpu: 0.0.40
codegen_flags: <defaults>
</compile_context>

<pallas_src>
import functools

import jax
import jax.numpy as jnp
from jax.experimental import pallas as pl
from jax.experimental.pallas import tpu as pltpu


def _round_up(a: int, b: int) -> int:
    return ((a + b - 1) // b) * b


def _ffn_kernel(x_ref, w1_ref, b1_ref, w2_ref, b2_ref, o_ref, acc_ref):
    # x_ref:  (tm, d_model)          resident across the d_ff axis
    # w1_ref: (d_model, tf)          d_ff-chunk of fc1 weights
    # b1_ref: (1, tf)                d_ff-chunk of fc1 bias
    # w2_ref: (tf, d_model)          d_ff-chunk of fc2 weights
    # b2_ref: (1, d_model)           fc2 bias (folded into accumulator init)
    # o_ref:  (tm, d_model)          output tile (written once, at last f)
    # acc_ref:(tm, d_model) f32      VMEM accumulator
    f = pl.program_id(1)

    @pl.when(f == 0)
    def _init():
        # Fold the output bias into the accumulator init (one broadcast per row tile,
        # removes a full VPU pass over the output tile at the end).
        acc_ref[...] = jnp.broadcast_to(
            b2_ref[...].astype(jnp.float32), acc_ref.shape)

    # fc1 chunk: (tm, d_model) @ (d_model, tf) -> f32 (tm, tf), bias + ReLU in f32.
    h = jnp.dot(x_ref[...], w1_ref[...], preferred_element_type=jnp.float32)
    h = jnp.maximum(h + b1_ref[...].astype(jnp.float32), 0.0)

    # fc2 chunk: downcast once to the weight dtype, accumulate in f32.
    acc_ref[...] += jnp.dot(h.astype(w2_ref.dtype), w2_ref[...],
                            preferred_element_type=jnp.float32)

    @pl.when(f == pl.num_programs(1) - 1)
    def _finalize():
        o_ref[...] = acc_ref[...].astype(o_ref.dtype)


@functools.partial(jax.jit, static_argnames=("tm", "tf", "vmem_limit_bytes"))
def position_wise_feed_forward(x, w1, b1, w2, b2, *,
                               tm: int = 256,
                               tf: int = 512,
                               vmem_limit_bytes: int = 64 * 1024 * 1024):
    """x: (batch, seq_len, d_model) -> (batch, seq_len, d_model)."""
    B, S, d_model = x.shape
    d_ff = w1.shape[1]
    M = B * S

    x2d = x.reshape(M, d_model)

    # --- Row (token) tiling: pad M instead of asserting divisibility. ---
    tm_eff = min(tm, _round_up(M, 8))          # keep sublane-aligned, never oversize
    m_pad = _round_up(M, tm_eff)
    if m_pad != M:
        x2d = jnp.pad(x2d, ((0, m_pad - M), (0, 0)))

    # --- d_ff tiling: pad d_ff with zero columns/rows (zero contribution). ---
    if d_ff <= tf:
        tf_eff = d_ff                          # full dim -> always a legal block
        dff_pad = d_ff
    else:
        tf_eff = tf                            # default 512: multiple of 128
        dff_pad = _round_up(d_ff, tf_eff)
    if dff_pad != d_ff:
        w1 = jnp.pad(w1, ((0, 0), (0, dff_pad - d_ff)))
        b1 = jnp.pad(b1, (0, dff_pad - d_ff))
        w2 = jnp.pad(w2, ((0, dff_pad - d_ff), (0, 0)))

    b1_2d = b1.reshape(1, dff_pad)
    b2_2d = b2.reshape(1, d_model)

    grid = (m_pad // tm_eff, dff_pad // tf_eff)

    out2d = pl.pallas_call(
        _ffn_kernel,
        out_shape=jax.ShapeDtypeStruct((m_pad, d_model), x.dtype),
        grid_spec=pltpu.PrefetchScalarGridSpec(
            num_scalar_prefetch=0,
            grid=grid,
            in_specs=[
                # x tile: resident across the d_ff (reduction) axis.
                pl.BlockSpec((tm_eff, d_model), lambda i, f: (i, 0)),
                # w1 / b1: stream d_ff chunks.
                pl.BlockSpec((d_model, tf_eff), lambda i, f: (0, f)),
                pl.BlockSpec((1, tf_eff), lambda i, f: (0, f)),
                # w2: stream matching d_ff chunks.
                pl.BlockSpec((tf_eff, d_model), lambda i, f: (f, 0)),
                # b2: constant, folded into accumulator init.
                pl.BlockSpec((1, d_model), lambda i, f: (0, 0)),
            ],
            out_specs=pl.BlockSpec((tm_eff, d_model), lambda i, f: (i, 0)),
            scratch_shapes=[pltpu.VMEM((tm_eff, d_model), jnp.float32)],
        ),
        compiler_params=pltpu.CompilerParams(
            dimension_semantics=("parallel", "arbitrary"),
            vmem_limit_bytes=vmem_limit_bytes,
        ),
    )(x2d, w1, b1_2d, w2, b2_2d)

    return out2d[:M].reshape(B, S, d_model)


if __name__ == "__main__":
    # Small shapes consistent with the module's forward: (batch, seq_len, d_model).
    batch, seq_len, d_model, d_ff = 2, 8, 32, 64

    key = jax.random.PRNGKey(0)
    kx, kw1, kb1, kw2, kb2 = jax.random.split(key, 5)

    x = jax.random.normal(kx, (batch, seq_len, d_model), dtype=jnp.float32)
    # Parameters stored transposed relative to PyTorch's (out_features, in_features).
    w1 = jax.random.normal(kw1, (d_model, d_ff), dtype=jnp.float32) * 0.05
    b1 = jax.random.normal(kb1, (d_ff,), dtype=jnp.float32) * 0.05
    w2 = jax.random.normal(kw2, (d_ff, d_model), dtype=jnp.float32) * 0.05
    b2 = jax.random.normal(kb2, (d_model,), dtype=jnp.float32) * 0.05

    out = position_wise_feed_forward(x, w1, b1, w2, b2)
    out = jax.block_until_ready(out)

    # Pure-JAX reference (same math as PyTorch fc2(relu(fc1(x)))).
    ref = jnp.maximum(x @ w1 + b1, 0.0) @ w2 + b2
    assert out.shape == (batch, seq_len, d_model)
    assert jnp.allclose(out, ref, atol=1e-5, rtol=1e-5), float(
        jnp.max(jnp.abs(out - ref)))

    print("KERNEL_OK")
</pallas_src>

<mosaic_0001>
module attributes {stable_mosaic.version = 11 : i64} {
  func.func @_ffn_kernel(%arg0: i32, %arg1: i32, %arg2: memref<16x32xf32, #tpu.memory_space<vmem>>, %arg3: memref<32x64xf32, #tpu.memory_space<vmem>>, %arg4: memref<1x64xf32, #tpu.memory_space<vmem>>, %arg5: memref<64x32xf32, #tpu.memory_space<vmem>>, %arg6: memref<1x32xf32, #tpu.memory_space<vmem>>, %arg7: memref<16x32xf32, #tpu.memory_space<vmem>>, %arg8: memref<16x32xf32, #tpu.memory_space<vmem>>) attributes {dimension_semantics = [#tpu.dimension_semantics<parallel>, #tpu.dimension_semantics<arbitrary>], iteration_bounds = array<i64: 1, 1>, scalar_prefetch = 0 : i64, scratch_operands = 1 : i64, tpu.core_type = #tpu.core_type<tc>, window_params = [{transform_indices = @transform_0, window_bounds = array<i64: 16, 32>}, {transform_indices = @transform_1, window_bounds = array<i64: 32, 64>}, {transform_indices = @transform_2, window_bounds = array<i64: 1, 64>}, {transform_indices = @transform_3, window_bounds = array<i64: 64, 32>}, {pipeline_mode = #tpu.pipeline_mode<synchronous>, transform_indices = @transform_4, window_bounds = array<i64: 1, 32>}, {transform_indices = @transform_5, window_bounds = array<i64: 16, 32>}]} {
    %c0_i32 = arith.constant 0 : i32
    %0 = arith.cmpi eq, %arg1, %c0_i32 : i32
    %1 = arith.extui %0 : i1 to i32
    %c0_i32_0 = arith.constant 0 : i32
    %2 = arith.cmpi ne, %1, %c0_i32_0 : i32
    scf.if %2 {
      %c0_16 = arith.constant 0 : index
      %c0_17 = arith.constant 0 : index
      %19 = vector.load %arg6[%c0_16, %c0_17] : memref<1x32xf32, #tpu.memory_space<vmem>>, vector<1x32xf32>
      %20 = vector.shape_cast %19 : vector<1x32xf32> to vector<1x32xf32>
      %21 = vector.broadcast %20 : vector<1x32xf32> to vector<16x32xf32>
      %c0_18 = arith.constant 0 : index
      %c0_19 = arith.constant 0 : index
      %22 = vector.load %arg8[%c0_18, %c0_19] : memref<16x32xf32, #tpu.memory_space<vmem>>, vector<16x32xf32>
      tpu.vector_store %arg8[%c0_18, %c0_19], %21 {strides = array<i32>} : memref<16x32xf32, #tpu.memory_space<vmem>>, vector<16x32xf32>,
    } else {
    }
    %c0 = arith.constant 0 : index
    %c0_1 = arith.constant 0 : index
    %3 = vector.load %arg2[%c0, %c0_1] : memref<16x32xf32, #tpu.memory_space<vmem>>, vector<16x32xf32>
    %c0_2 = arith.constant 0 : index
    %c0_3 = arith.constant 0 : index
    %4 = vector.load %arg3[%c0_2, %c0_3] : memref<32x64xf32, #tpu.memory_space<vmem>>, vector<32x64xf32>
    %cst = arith.constant dense<0.000000e+00> : vector<16x64xf32>
    %5 = tpu.matmul %3, %4, %cst {dimension_numbers = #tpu.dot_dimension_numbers<[1], [0], [0], [1], [0, 0, 1, 1], [], []>} : vector<16x32xf32>, vector<32x64xf32>, vector<16x64xf32> -> vector<16x64xf32>
    %c0_4 = arith.constant 0 : index
    %c0_5 = arith.constant 0 : index
    %6 = vector.load %arg4[%c0_4, %c0_5] : memref<1x64xf32, #tpu.memory_space<vmem>>, vector<1x64xf32>
    %7 = vector.broadcast %6 : vector<1x64xf32> to vector<16x64xf32>
    %8 = arith.addf %5, %7 : vector<16x64xf32>
    %cst_6 = arith.constant 0.000000e+00 : f32
    %9 = vector.broadcast %cst_6 : f32 to vector<16x64xf32>
    %10 = arith.maximumf %8, %9 : vector<16x64xf32>
    %c0_7 = arith.constant 0 : index
    %c0_8 = arith.constant 0 : index
    %11 = vector.load %arg8[%c0_7, %c0_8] : memref<16x32xf32, #tpu.memory_space<vmem>>, vector<16x32xf32>
    %c0_9 = arith.constant 0 : index
    %c0_10 = arith.constant 0 : index
    %12 = vector.load %arg5[%c0_9, %c0_10] : memref<64x32xf32, #tpu.memory_space<vmem>>, vector<64x32xf32>
    %cst_11 = arith.constant dense<0.000000e+00> : vector<16x32xf32>
    %13 = tpu.matmul %10, %12, %cst_11 {dimension_numbers = #tpu.dot_dimension_numbers<[1], [0], [0], [1], [0, 0, 1, 1], [], []>} : vector<16x64xf32>, vector<64x32xf32>, vector<16x32xf32> -> vector<16x32xf32>
    %14 = arith.addf %11, %13 : vector<16x32xf32>
    %c0_12 = arith.constant 0 : index
    %c0_13 = arith.constant 0 : index
    %15 = vector.load %arg8[%c0_12, %c0_13] : memref<16x32xf32, #tpu.memory_space<vmem>>, vector<16x32xf32>
    tpu.vector_store %arg8[%c0_12, %c0_13], %14 {strides = array<i32>} : memref<16x32xf32, #tpu.memory_space<vmem>>, vector<16x32xf32>,
    %c0_i32_14 = arith.constant 0 : i32
    %16 = arith.cmpi eq, %arg1, %c0_i32_14 : i32
    %17 = arith.extui %16 : i1 to i32
    %c0_i32_15 = arith.constant 0 : i32
    %18 = arith.cmpi ne, %17, %c0_i32_15 : i32
    scf.if %18 {
      %c0_16 = arith.constant 0 : index
      %c0_17 = arith.constant 0 : index
      %19 = vector.load %arg8[%c0_16, %c0_17] : memref<16x32xf32, #tpu.memory_space<vmem>>, vector<16x32xf32>
      %c0_18 = arith.constant 0 : index
      %c0_19 = arith.constant 0 : index
      %20 = vector.load %arg7[%c0_18, %c0_19] : memref<16x32xf32, #tpu.memory_space<vmem>>, vector<16x32xf32>
      tpu.vector_store %arg7[%c0_18, %c0_19], %19 {strides = array<i32>} : memref<16x32xf32, #tpu.memory_space<vmem>>, vector<16x32xf32>,
    } else {
    }
    return
  }
  func.func @transform_0(%arg0: i32, %arg1: i32) -> (i32, i32) {
    %c0_i32 = arith.constant 0 : i32
    %c0_i32_0 = arith.constant 0 : i32
    return %arg0, %c0_i32 : i32, i32
  }
  func.func @transform_1(%arg0: i32, %arg1: i32) -> (i32, i32) {
    %c0_i32 = arith.constant 0 : i32
    %c0_i32_0 = arith.constant 0 : i32
    return %c0_i32, %arg1 : i32, i32
  }
  func.func @transform_2(%arg0: i32, %arg1: i32) -> (i32, i32) {
    %c0_i32 = arith.constant 0 : i32
    %c0_i32_0 = arith.constant 0 : i32
    return %c0_i32, %arg1 : i32, i32
  }
  func.func @transform_3(%arg0: i32, %arg1: i32) -> (i32, i32) {
    %c0_i32 = arith.constant 0 : i32
    %c0_i32_0 = arith.constant 0 : i32
    return %arg1, %c0_i32 : i32, i32
  }
  func.func @transform_4(%arg0: i32, %arg1: i32) -> (i32, i32) {
    %c0_i32 = arith.constant 0 : i32
    %c0_i32_0 = arith.constant 0 : i32
    %c0_i32_1 = arith.constant 0 : i32
    return %c0_i32, %c0_i32_0 : i32, i32
  }
  func.func @transform_5(%arg0: i32, %arg1: i32) -> (i32, i32) {
    %c0_i32 = arith.constant 0 : i32
    %c0_i32_0 = arith.constant 0 : i32
    return %arg0, %c0_i32 : i32, i32
  }
}

</mosaic_0001>

<bundles_post_ra>
// kernel: position_wise_feed_forward.1
= control target key start
LH: loop header
LB: loop body
LE: loop exit
PB: predicated region body
PF: predicated region fallthrough
CT: control target
= control target key end

     0   :  { %s282_s0 = inlined_call_operand.vmem [shape: f32[16,32], index: 0, kind: input, shape index: {}]   ;;  %s283_s1 = inlined_call_operand.vmem [shape: f32[32,64], index: 1, kind: input, shape index: {}]   ;;  %s284_s2 = inlined_call_operand.vmem [shape: f32[1,64], index: 2, kind: input, shape index: {}]   ;;  %s285_s3 = inlined_call_operand.vmem [shape: f32[64,32], index: 3, kind: input, shape index: {}]   ;;  %s286_s4 = inlined_call_operand.vmem [shape: f32[1,32], index: 4, kind: input, shape index: {}]   ;;  %s287_s5 = inlined_call_operand.hbm [shape: f32[16,32], index: 5, kind: output, shape index: {}]  }
   0x1   :  { %v37_v0 = vld [vmem:[%s283_s1 + $0x18] sm:$0xff]  ;;  %v36_v1 = vld [vmem:[%s283_s1 + $0x10] sm:$0xff]  ;;  %v35_v2 = vld [vmem:[%s283_s1 + $0x8] sm:$0xff] }
   0x2   :  { %147 = vmatpush.msra.mxu3 %v37_v0  ;;  %61 = vmatpush.msra.mxu0 %v37_v0  ;;  %v83_v3 = vld [vmem:[%s285_s3 + $0x38] sm:$0xff]  ;;  %v82_v4 = vld [vmem:[%s285_s3 + $0x30] sm:$0xff]  ;;  %v34_v5 = vld [vmem:[%s283_s1] sm:$0xff] }
   0x3   :  { %151 = vmatpush.msra.mxu2 %v83_v3  ;;  %99 = vmatpush.msra.mxu1 %v83_v3 }
   0x4   :  { %148 = vmatpush.msra.mxu3 %v36_v1  ;;  %62 = vmatpush.msra.mxu0 %v36_v1 }
   0x5   :  { %10 = vsyncpa [#allocation4], 0  ;;  %vm29_vm0 = vcmask 261120   ;;  %v33_v6 = vld [vmem:[%s282_s0 + $0x8] sm:$0xff]  ;;  %v32_v7 = vld [vmem:[%s282_s0] sm:$0xff]  ;;  %152 = vmatpush.msra.mxu2 %v82_v4  ;;  %100 = vmatpush.msra.mxu1 %v82_v4  ;;  %vm84_vm1 = vcmask 523264  }
   0x6   :  { %149 = vmatpush.msra.mxu3 %v35_v2  ;;  %63 = vmatpush.msra.mxu0 %v35_v2  ;;  %v81_v8 = vld [vmem:[%s285_s3 + $0x28] sm:$0xff]  ;;  %v80_v9 = vld [vmem:[%s285_s3 + $0x20] sm:$0xff]  ;;  %v79_v10 = vld [vmem:[%s285_s3 + $0x18] sm:$0xff]  ;;  %s131_s24 = sshll.u32 %s287_s5, 4  ;;  %s191_s25 = smov 128   ;;  %s132_s24 = int_to_ptr.hbm [resolvable:$true] %s131_s24 }
   0x7   :  { %153 = vmatpush.msra.mxu2 %v81_v8  ;;  %101 = vmatpush.msra.mxu1 %v81_v8  ;;  %v78_v11 = vld [vmem:[%s285_s3 + $0x10] sm:$0xff]  ;;  %v77_v12 = vld [vmem:[%s285_s3 + $0x8] sm:$0xff]  ;;  %v76_v13 = vld [vmem:[%s285_s3] sm:$0xff]  ;;  %s192_s26 = smov 8  }
   0x8   :  { %150 = vmatpush.msra.mxu3 %v34_v5  ;;  %64 = vmatpush.msra.mxu0 %v34_v5  ;;  %v163_v14 = vld [vmem:[%s286_s4] ss:$0 sm:$0xff] }
   0x9   :  { %144 = vmatmul.msk.f32.vlgmr.msra.gmra.mxu3 %vm29_vm0, %v33_v6  ;;  %143 = vmatmul.msk.f32.vlgmr.msra.gmra.mxu0 %vm29_vm0, %v32_v7  ;;  %30 = vst.msk [vmem:[#allocation2] sm:$0xff] %vm29_vm0, %v163_v14  ;;  %v162_v15 = vld [vmem:[%s284_s2] ss:$0 sm:$0xff]  ;;  %s190_s2 = smov [#allocation3]  }
   0xa   :  { %154 = vmatpush.msra.mxu2 %v80_v9  ;;  %102 = vmatpush.msra.mxu1 %v80_v9  ;;  %31 = vst.msk [vmem:[#allocation2 + $0x8] sm:$0xff] %vm29_vm0, %v163_v14  ;;  %s129_s3 = sshll.u32 %s190_s2, 4  ;;  %s130_s3 = int_to_ptr.vmem [resolvable:$true] %s129_s3 }
   0xc   :  { %155 = vmatpush.msra.mxu2 %v79_v10  ;;  %103 = vmatpush.msra.mxu1 %v79_v10 }
   0xe   :  { %156 = vmatpush.msra.mxu2 %v78_v11  ;;  %104 = vmatpush.msra.mxu1 %v78_v11 }
  0x10   :  { %157 = vmatpush.msra.mxu2 %v77_v12  ;;  %105 = vmatpush.msra.mxu1 %v77_v12  ;;  %v74_v22 = vld [vmem:[#allocation2] sm:$0xff] }
  0x11   :  { %v75_v25 = vld [vmem:[#allocation2 + $0x8] sm:$0xff] }
  0x12   :  { %158 = vmatpush.msra.mxu2 %v76_v13  ;;  %106 = vmatpush.msra.mxu1 %v76_v13 }
  0x86   :  { %v66_v16 = vpop.f32.mrf.mxu0 }
  0x87   :  { %v67_v17 = vadd.f32 %v162_v15, %v66_v16 }
  0x89   :  { %v72_v18 = vmax.f32 %v67_v17, 0.0 }
  0x8b   :  { %145 = vmatmul.msk.f32.vlgmr.msra.gmra.mxu1 %vm84_vm1, %v72_v18 }
  0x8c   :  { %v69_v19 = vpop.f32.mrf.mxu3 }
  0x8d   :  { %v70_v20 = vadd.f32 %v162_v15, %v69_v19 }
  0x8f   :  { %v73_v21 = vmax.f32 %v70_v20, 0.0 }
  0x91   :  { %146 = vmatmul.msk.f32.vlgmr.msra.gmra.mxu2 %vm84_vm1, %v73_v21 }
 0x108   :  { %v108_v23 = vpop.f32.mrf.mxu1 }
 0x109   :  { %v114_v24 = vadd.f32 %v108_v23, %v74_v22 }
 0x10b   :  { %116 = vst.msk [vmem:[#allocation2] sm:$0xff] %vm29_vm0, %v114_v24 }
 0x112   :  { %v121_v26 = vld [vmem:[#allocation2] sm:$0xff] }
 0x113   :  { %123 = vst.msk [vmem:[#allocation3] sm:$0xff] %vm29_vm0, %v121_v26 }
 0x114   :  { %v111_v27 = vpop.f32.mrf.mxu2 }
 0x115   :  { %v115_v28 = vadd.f32 %v111_v27, %v75_v25 }
 0x117   :  { %117 = vst.msk [vmem:[#allocation2 + $0x8] sm:$0xff] %vm29_vm0, %v115_v28 }
 0x11e   :  { %v122_v29 = vld [vmem:[#allocation2 + $0x8] sm:$0xff] }
 0x11f   :  { %124 = vst.msk [vmem:[#allocation3 + $0x8] sm:$0xff] %vm29_vm0, %v122_v29 }
 0x120   :  { %137 = dma.vmem_to_hbm [thread:$0]  %s130_s3, 256, %s132_s24, [#allocation4], %s191_s25, %s191_s25, %s192_s26  }
 0x121   :  { %188 = dma.done.wait [#allocation4], 256  }
 0x122   :  { %189 = vsyncadd [#allocation4], 4294967040 }
 0x123   :  { %142 = vsyncpa [#allocation4], 1 }

</bundles_post_ra>
